<compile_context>
chip_gen: v7x
topology: tpu7x:2x2x1
jax: 0.10.0
libtpu: 0.0.40
codegen_flags: <defaults>
</compile_context>

<pallas_src>
import functools

import jax
import jax.numpy as jnp
from jax import lax
from jax.experimental import pallas as pl
from jax.experimental.pallas import tpu as pltpu

NLAYER = 2
NC_PAD = 128  # lane-dense padded class dimension for the output store
BIAS_ROWS = 8  # one (8,128) f32 tile holds every bias vector


def structgnn_kernel(x_ref, adj_ref, wpre_ref, bias_ref,
                     w1s_ref, w2s_ref, mems_ref, wlin_ref, out_ref):
    f32, bf16 = jnp.float32, jnp.bfloat16
    dot = lambda a, b: jnp.dot(a, b, preferred_element_type=f32)

    nlayer = w1s_ref.shape[0]
    H = wpre_ref.shape[1]

    adj = adj_ref[...]                                      # (N, N) bf16

    # pre_conv: Linear(nfeat, nhid).  bias row 0 of the packed (8,128) tile.
    h = dot(x_ref[...], wpre_ref[...]) + bias_ref[0:1, :H]  # (N, H) f32

    xs = []
    for l in range(nlayer):                                 # statically unrolled
        hb = h.astype(bf16)
        # StructConv: sum-aggregate in-neighbors via dense A @ H on the MXU.
        agg = dot(adj, hb)                                  # (N, H) f32
        b1 = bias_ref[1 + 2 * l: 2 + 2 * l, :H]             # (1, H) f32
        b2 = bias_ref[2 + 2 * l: 3 + 2 * l, :H]             # (1, H) f32
        # MLP hidden layer on [h || agg] WITHOUT the concat: two dots summed
        # in f32 (identical math, no cross-lane repack / extra VMEM buffer).
        z = (dot(hb, w1s_ref[l, 0:H, :])
             + dot(agg.astype(bf16), w1s_ref[l, H:2 * H, :])
             + b1)
        z = jnp.maximum(z, 0.0)                             # MLP hidden ReLU
        z = jnp.maximum(dot(z.astype(bf16), w2s_ref[l]) + b2, 0.0)  # out + F.relu

        # MemModule ('dp' attention): sim = z @ mem^T as an NT dot_general
        # (contract last dims) - no materialized transpose.
        mem = mems_ref[l]                                   # (K, H) bf16
        sim = lax.dot_general(z.astype(bf16), mem,
                              (((1,), (1,)), ((), ())),
                              preferred_element_type=f32)   # (N, K) f32
        sim = sim - jnp.max(sim, axis=-1, keepdims=True)
        e = jnp.exp(sim)
        s = e * pl.reciprocal(jnp.sum(e, axis=-1, keepdims=True), approx=True)
        h = dot(s.astype(bf16), mem)                        # read-out (N, H) f32
        xs.append(h)

    # res=True classifier: lin(concat(xs, -1)) as split dots (no concat).
    # Padded wlin columns are exactly 0 in bf16 and bias row 5 carries -1e9 on
    # the padded lanes, so they never win the max and exp to 0: the log-softmax
    # over the lane-dense (N,128) slab equals log-softmax over nclass.
    y = bias_ref[5:6, :]                                    # (1, 128) f32
    for l in range(nlayer):
        y = y + dot(xs[l].astype(bf16), wlin_ref[l * H:(l + 1) * H, :])
    m = jnp.max(y, axis=-1, keepdims=True)
    ys = y - m
    lse = jnp.log(jnp.sum(jnp.exp(ys), axis=-1, keepdims=True))
    out_ref[...] = ys - lse


def pack_structgnn_params(params):
    """Host-side packing: called ONCE (hoisted out of the per-forward path)."""
    f32, bf16 = jnp.float32, jnp.bfloat16
    H = params["wpre"].shape[1]
    nclass = params["wlin"].shape[-1]

    wpre = params["wpre"].astype(bf16)                                   # (F, H)
    w1s = jnp.stack([params["w1_0"], params["w1_1"]]).astype(bf16)       # (2, 2H, H)
    w2s = jnp.stack([params["w2_0"], params["w2_1"]]).astype(bf16)       # (2, H, H)
    mems = jnp.stack([params["mem_0"], params["mem_1"]]).astype(bf16)    # (2, K, H)

    # Single (8,128) f32 bias tile: rows 0..4 = bpre, b1_0, b2_0, b1_1, b2_1
    # (lanes [:H]); row 5 = blin over 128 lanes, -1e9 on padded class lanes.
    bias = jnp.zeros((BIAS_ROWS, NC_PAD), f32)
    bias = bias.at[0, :H].set(params["bpre"][0])
    bias = bias.at[1, :H].set(params["b1_0"][0])
    bias = bias.at[2, :H].set(params["b2_0"][0])
    bias = bias.at[3, :H].set(params["b1_1"][0])
    bias = bias.at[4, :H].set(params["b2_1"][0])
    blin_row = jnp.full((NC_PAD,), -1e9, f32).at[:nclass].set(params["blin"][0])
    bias = bias.at[5, :].set(blin_row)

    # Lane-dense classifier weight: class dim padded to 128 with exact zeros.
    wlin = jnp.zeros((params["wlin"].shape[0], NC_PAD), f32)
    wlin = wlin.at[:, :nclass].set(params["wlin"]).astype(bf16)          # (2H, 128)

    return (wpre, bias, w1s, w2s, mems, wlin)


@functools.partial(jax.jit, static_argnames=("nclass",))
def structgnn_forward(x, adj, packed, *, nclass):
    """Runs the fused Pallas kernel on pre-packed parameters."""
    bf16 = jnp.bfloat16
    n_nodes = x.shape[0]
    vmem = pl.BlockSpec(memory_space=pltpu.MemorySpace.VMEM)
    out = pl.pallas_call(
        structgnn_kernel,
        out_shape=jax.ShapeDtypeStruct((n_nodes, NC_PAD), jnp.float32),
        in_specs=[vmem] * (2 + len(packed)),
        out_specs=vmem,
    )(x.astype(bf16), adj.astype(bf16), *packed)
    # NOTE: at large N, consume the padded (N,128) slab directly instead of
    # paying this full-slab re-read for 4 useful lanes; fine at toy sizes.
    return out[:, :nclass]


def structgnn_reference_f32(x, adj, p):
    """Pure-f32 pure-JAX reference matching the PyTorch module semantics."""
    h = x @ p["wpre"] + p["bpre"]
    xs = []
    for l in range(NLAYER):
        agg = adj @ h
        z = jnp.maximum(jnp.concatenate([h, agg], -1) @ p[f"w1_{l}"] + p[f"b1_{l}"], 0.0)
        z = jnp.maximum(z @ p[f"w2_{l}"] + p[f"b2_{l}"], 0.0)
        s = jax.nn.softmax(z @ p[f"mem_{l}"].T, axis=-1)
        h = s @ p[f"mem_{l}"]
        xs.append(h)
    y = jnp.concatenate(xs, -1) @ p["wlin"] + p["blin"]
    return jax.nn.log_softmax(y, axis=1)


def structgnn_reference_bf16(x, adj, p):
    """JAX reference mirroring the kernel's bf16-operand / f32-accumulate math."""
    bf16, f32 = jnp.bfloat16, jnp.float32
    dot = lambda a, b: jnp.dot(a, b, preferred_element_type=f32)
    H = p["wpre"].shape[1]
    adjb = adj.astype(bf16)
    h = dot(x.astype(bf16), p["wpre"].astype(bf16)) + p["bpre"]
    xs = []
    for l in range(NLAYER):
        hb = h.astype(bf16)
        agg = dot(adjb, hb)
        w1 = p[f"w1_{l}"].astype(bf16)
        z = dot(hb, w1[:H]) + dot(agg.astype(bf16), w1[H:]) + p[f"b1_{l}"]
        z = jnp.maximum(z, 0.0)
        z = jnp.maximum(dot(z.astype(bf16), p[f"w2_{l}"].astype(bf16)) + p[f"b2_{l}"], 0.0)
        mem = p[f"mem_{l}"].astype(bf16)
        sim = lax.dot_general(z.astype(bf16), mem, (((1,), (1,)), ((), ())),
                              preferred_element_type=f32)
        s = jax.nn.softmax(sim, axis=-1)
        h = dot(s.astype(bf16), mem)
        xs.append(h)
    wlin = p["wlin"].astype(bf16)
    y = (dot(xs[0].astype(bf16), wlin[:H]) + dot(xs[1].astype(bf16), wlin[H:])
         + p["blin"])
    return jax.nn.log_softmax(y, axis=1)


if __name__ == "__main__":
    # Small synthetic sizes consistent with the module's __init__.
    N_NODES, NFEAT, NHID, NCLASS = 32, 16, 32, 4
    N_MEM = [8, 8]

    key = jax.random.PRNGKey(0)
    keys = jax.random.split(key, 20)

    def init(k, shape, scale=0.1):
        return (scale * jax.random.normal(k, shape)).astype(jnp.float32)

    # Node features.
    x = init(keys[0], (N_NODES, NFEAT), scale=1.0)

    # Random sparse edge_index -> dense adjacency (edge_weight=None -> 1.0).
    # Edge multiplicities stay tiny, so the bf16 adjacency cast is exact here.
    n_edges = 96
    src = jax.random.randint(keys[1], (n_edges,), 0, N_NODES)
    dst = jax.random.randint(keys[2], (n_edges,), 0, N_NODES)
    adj = jnp.zeros((N_NODES, N_NODES), jnp.float32).at[dst, src].add(1.0)

    params = {
        # pre_conv: Linear(nfeat, nhid)
        "wpre": init(keys[3], (NFEAT, NHID)),
        "bpre": init(keys[4], (1, NHID)),
        # layer 0 conv MLP(2*nhid -> nhid -> nhid) + memory cells
        "w1_0": init(keys[5], (2 * NHID, NHID)),
        "b1_0": init(keys[6], (1, NHID)),
        "w2_0": init(keys[7], (NHID, NHID)),
        "b2_0": init(keys[8], (1, NHID)),
        "mem_0": init(keys[9], (N_MEM[0], NHID), scale=1.0),
        # layer 1
        "w1_1": init(keys[10], (2 * NHID, NHID)),
        "b1_1": init(keys[11], (1, NHID)),
        "w2_1": init(keys[12], (NHID, NHID)),
        "b2_1": init(keys[13], (1, NHID)),
        "mem_1": init(keys[14], (N_MEM[1], NHID), scale=1.0),
        # final lin: Linear(nhid * nlayer, nclass)
        "wlin": init(keys[15], (NHID * NLAYER, NCLASS)),
        "blin": init(keys[16], (1, NCLASS)),
    }

    # Pack once (host-side); the jitted forward only sees packed operands.
    packed = jax.block_until_ready(pack_structgnn_params(params))

    out = structgnn_forward(x, adj, packed, nclass=NCLASS)
    out = jax.block_until_ready(out)
    assert out.shape == (N_NODES, NCLASS)

    # Implementation check: matches a JAX reference mirroring the kernel's
    # bf16-operand / f32-accumulate arithmetic (approx reciprocal is the only
    # remaining difference).
    ref_bf16 = structgnn_reference_bf16(x, adj, params)
    assert jnp.allclose(out, ref_bf16, atol=1e-2, rtol=1e-2), \
        "mismatch vs bf16-mirror reference"

    # Semantic check: close to the full-f32 module math (bf16 MXU operands
    # introduce small, expected differences).
    ref_f32 = structgnn_reference_f32(x, adj, params)
    assert jnp.allclose(out, ref_f32, atol=5e-2, rtol=5e-2), \
        "mismatch vs f32 reference"

    # log-softmax rows must exp-sum to 1 (checks the padded-lane handling).
    assert jnp.allclose(jnp.sum(jnp.exp(out), axis=1), 1.0, atol=1e-3)

    print("KERNEL_OK")
</pallas_src>

<mosaic_0001>
module attributes {stable_mosaic.version = 11 : i64} {
  func.func @structgnn_kernel(%arg0: memref<32x16xbf16, #tpu.memory_space<vmem>>, %arg1: memref<32x32xbf16, #tpu.memory_space<vmem>>, %arg2: memref<16x32xbf16, #tpu.memory_space<vmem>>, %arg3: memref<8x128xf32, #tpu.memory_space<vmem>>, %arg4: memref<2x64x32xbf16, #tpu.memory_space<vmem>>, %arg5: memref<2x32x32xbf16, #tpu.memory_space<vmem>>, %arg6: memref<2x8x32xbf16, #tpu.memory_space<vmem>>, %arg7: memref<64x128xbf16, #tpu.memory_space<vmem>>, %arg8: memref<32x128xf32, #tpu.memory_space<vmem>>) attributes {dimension_semantics = [], scalar_prefetch = 0 : i64, scratch_operands = 0 : i64, tpu.core_type = #tpu.core_type<tc>} {
    %c0 = arith.constant 0 : index
    %c0_0 = arith.constant 0 : index
    %0 = vector.load %arg1[%c0, %c0_0] : memref<32x32xbf16, #tpu.memory_space<vmem>>, vector<32x32xbf16>
    %c0_1 = arith.constant 0 : index
    %c0_2 = arith.constant 0 : index
    %1 = vector.load %arg0[%c0_1, %c0_2] : memref<32x16xbf16, #tpu.memory_space<vmem>>, vector<32x16xbf16>
    %c0_3 = arith.constant 0 : index
    %c0_4 = arith.constant 0 : index
    %2 = vector.load %arg2[%c0_3, %c0_4] : memref<16x32xbf16, #tpu.memory_space<vmem>>, vector<16x32xbf16>
    %cst = arith.constant dense<0.000000e+00> : vector<32x32xf32>
    %3 = tpu.matmul %1, %2, %cst {dimension_numbers = #tpu.dot_dimension_numbers<[1], [0], [0], [1], [0, 0, 1, 1], [], []>} : vector<32x16xbf16>, vector<16x32xbf16>, vector<32x32xf32> -> vector<32x32xf32>
    %c0_5 = arith.constant 0 : index
    %c0_6 = arith.constant 0 : index
    %4 = vector.load %arg3[%c0_5, %c0_6] : memref<8x128xf32, #tpu.memory_space<vmem>>, vector<1x32xf32>
    %5 = vector.broadcast %4 : vector<1x32xf32> to vector<32x32xf32>
    %6 = arith.addf %3, %5 : vector<32x32xf32>
    %7 = arith.truncf %6 : vector<32x32xf32> to vector<32x32xbf16>
    %cst_7 = arith.constant dense<0.000000e+00> : vector<32x32xf32>
    %8 = tpu.matmul %0, %7, %cst_7 {dimension_numbers = #tpu.dot_dimension_numbers<[1], [0], [0], [1], [0, 0, 1, 1], [], []>} : vector<32x32xbf16>, vector<32x32xbf16>, vector<32x32xf32> -> vector<32x32xf32>
    %c1 = arith.constant 1 : index
    %c0_8 = arith.constant 0 : index
    %9 = vector.load %arg3[%c1, %c0_8] : memref<8x128xf32, #tpu.memory_space<vmem>>, vector<1x32xf32>
    %c2 = arith.constant 2 : index
    %c0_9 = arith.constant 0 : index
    %10 = vector.load %arg3[%c2, %c0_9] : memref<8x128xf32, #tpu.memory_space<vmem>>, vector<1x32xf32>
    %c0_10 = arith.constant 0 : index
    %c0_11 = arith.constant 0 : index
    %c0_12 = arith.constant 0 : index
    %11 = vector.load %arg4[%c0_10, %c0_11, %c0_12] : memref<2x64x32xbf16, #tpu.memory_space<vmem>>, vector<1x32x32xbf16>
    %12 = vector.shape_cast %11 : vector<1x32x32xbf16> to vector<32x32xbf16>
    %cst_13 = arith.constant dense<0.000000e+00> : vector<32x32xf32>
    %13 = tpu.matmul %7, %12, %cst_13 {dimension_numbers = #tpu.dot_dimension_numbers<[1], [0], [0], [1], [0, 0, 1, 1], [], []>} : vector<32x32xbf16>, vector<32x32xbf16>, vector<32x32xf32> -> vector<32x32xf32>
    %14 = arith.truncf %8 : vector<32x32xf32> to vector<32x32xbf16>
    %c0_14 = arith.constant 0 : index
    %c32 = arith.constant 32 : index
    %c0_15 = arith.constant 0 : index
    %15 = vector.load %arg4[%c0_14, %c32, %c0_15] : memref<2x64x32xbf16, #tpu.memory_space<vmem>>, vector<1x32x32xbf16>
    %16 = vector.shape_cast %15 : vector<1x32x32xbf16> to vector<32x32xbf16>
    %cst_16 = arith.constant dense<0.000000e+00> : vector<32x32xf32>
    %17 = tpu.matmul %14, %16, %cst_16 {dimension_numbers = #tpu.dot_dimension_numbers<[1], [0], [0], [1], [0, 0, 1, 1], [], []>} : vector<32x32xbf16>, vector<32x32xbf16>, vector<32x32xf32> -> vector<32x32xf32>
    %18 = arith.addf %13, %17 : vector<32x32xf32>
    %19 = vector.broadcast %9 : vector<1x32xf32> to vector<32x32xf32>
    %20 = arith.addf %18, %19 : vector<32x32xf32>
    %cst_17 = arith.constant 0.000000e+00 : f32
    %21 = vector.broadcast %cst_17 : f32 to vector<32x32xf32>
    %22 = arith.maximumf %20, %21 : vector<32x32xf32>
    %23 = arith.truncf %22 : vector<32x32xf32> to vector<32x32xbf16>
    %c0_18 = arith.constant 0 : index
    %c0_19 = arith.constant 0 : index
    %c0_20 = arith.constant 0 : index
    %24 = vector.load %arg5[%c0_18, %c0_19, %c0_20] : memref<2x32x32xbf16, #tpu.memory_space<vmem>>, vector<1x32x32xbf16>
    %25 = vector.shape_cast %24 : vector<1x32x32xbf16> to vector<32x32xbf16>
    %cst_21 = arith.constant dense<0.000000e+00> : vector<32x32xf32>
    %26 = tpu.matmul %23, %25, %cst_21 {dimension_numbers = #tpu.dot_dimension_numbers<[1], [0], [0], [1], [0, 0, 1, 1], [], []>} : vector<32x32xbf16>, vector<32x32xbf16>, vector<32x32xf32> -> vector<32x32xf32>
    %27 = vector.broadcast %10 : vector<1x32xf32> to vector<32x32xf32>
    %28 = arith.addf %26, %27 : vector<32x32xf32>
    %cst_22 = arith.constant 0.000000e+00 : f32
    %29 = vector.broadcast %cst_22 : f32 to vector<32x32xf32>
    %30 = arith.maximumf %28, %29 : vector<32x32xf32>
    %c0_23 = arith.constant 0 : index
    %c0_24 = arith.constant 0 : index
    %c0_25 = arith.constant 0 : index
    %31 = vector.load %arg6[%c0_23, %c0_24, %c0_25] : memref<2x8x32xbf16, #tpu.memory_space<vmem>>, vector<1x8x32xbf16>
    %32 = vector.shape_cast %31 : vector<1x8x32xbf16> to vector<8x32xbf16>
    %33 = arith.truncf %30 : vector<32x32xf32> to vector<32x32xbf16>
    %cst_26 = arith.constant dense<0.000000e+00> : vector<32x8xf32>
    %34 = tpu.matmul %33, %32, %cst_26 {dimension_numbers = #tpu.dot_dimension_numbers<[1], [1], [0], [0], [0, 0, 1, 0], [], []>} : vector<32x32xbf16>, vector<8x32xbf16>, vector<32x8xf32> -> vector<32x8xf32>
    %cst_27 = arith.constant dense<0xFF800000> : vector<32xf32>
    %35 = vector.multi_reduction <maximumf>, %34, %cst_27 [1] : vector<32x8xf32> to vector<32xf32>
    %36 = vector.shape_cast %35 : vector<32xf32> to vector<32x1xf32>
    %37 = vector.broadcast %36 : vector<32x1xf32> to vector<32x8xf32>
    %38 = arith.subf %34, %37 : vector<32x8xf32>
    %39 = math.exp %38 : vector<32x8xf32>
    %cst_28 = arith.constant dense<0.000000e+00> : vector<32xf32>
    %40 = vector.multi_reduction <add>, %39, %cst_28 [1] : vector<32x8xf32> to vector<32xf32>
    %41 = vector.shape_cast %40 : vector<32xf32> to vector<32x1xf32>
    %42 = tpu.reciprocal %41 {approx = true} : vector<32x1xf32> -> vector<32x1xf32>
    %43 = vector.broadcast %42 : vector<32x1xf32> to vector<32x8xf32>
    %44 = arith.mulf %39, %43 : vector<32x8xf32>
    %45 = arith.truncf %44 : vector<32x8xf32> to vector<32x8xbf16>
    %cst_29 = arith.constant dense<0.000000e+00> : vector<32x32xf32>
    %46 = tpu.matmul %45, %32, %cst_29 {dimension_numbers = #tpu.dot_dimension_numbers<[1], [0], [0], [1], [0, 0, 1, 1], [], []>} : vector<32x8xbf16>, vector<8x32xbf16>, vector<32x32xf32> -> vector<32x32xf32>
    %47 = arith.truncf %46 : vector<32x32xf32> to vector<32x32xbf16>
    %cst_30 = arith.constant dense<0.000000e+00> : vector<32x32xf32>
    %48 = tpu.matmul %0, %47, %cst_30 {dimension_numbers = #tpu.dot_dimension_numbers<[1], [0], [0], [1], [0, 0, 1, 1], [], []>} : vector<32x32xbf16>, vector<32x32xbf16>, vector<32x32xf32> -> vector<32x32xf32>
    %c3 = arith.constant 3 : index
    %c0_31 = arith.constant 0 : index
    %49 = vector.load %arg3[%c3, %c0_31] : memref<8x128xf32, #tpu.memory_space<vmem>>, vector<1x32xf32>
    %c4 = arith.constant 4 : index
    %c0_32 = arith.constant 0 : index
    %50 = vector.load %arg3[%c4, %c0_32] : memref<8x128xf32, #tpu.memory_space<vmem>>, vector<1x32xf32>
    %c1_33 = arith.constant 1 : index
    %c0_34 = arith.constant 0 : index
    %c0_35 = arith.constant 0 : index
    %51 = vector.load %arg4[%c1_33, %c0_34, %c0_35] : memref<2x64x32xbf16, #tpu.memory_space<vmem>>, vector<1x32x32xbf16>
    %52 = vector.shape_cast %51 : vector<1x32x32xbf16> to vector<32x32xbf16>
    %cst_36 = arith.constant dense<0.000000e+00> : vector<32x32xf32>
    %53 = tpu.matmul %47, %52, %cst_36 {dimension_numbers = #tpu.dot_dimension_numbers<[1], [0], [0], [1], [0, 0, 1, 1], [], []>} : vector<32x32xbf16>, vector<32x32xbf16>, vector<32x32xf32> -> vector<32x32xf32>
    %54 = arith.truncf %48 : vector<32x32xf32> to vector<32x32xbf16>
    %c1_37 = arith.constant 1 : index
    %c32_38 = arith.constant 32 : index
    %c0_39 = arith.constant 0 : index
    %55 = vector.load %arg4[%c1_37, %c32_38, %c0_39] : memref<2x64x32xbf16, #tpu.memory_space<vmem>>, vector<1x32x32xbf16>
    %56 = vector.shape_cast %55 : vector<1x32x32xbf16> to vector<32x32xbf16>
    %cst_40 = arith.constant dense<0.000000e+00> : vector<32x32xf32>
    %57 = tpu.matmul %54, %56, %cst_40 {dimension_numbers = #tpu.dot_dimension_numbers<[1], [0], [0], [1], [0, 0, 1, 1], [], []>} : vector<32x32xbf16>, vector<32x32xbf16>, vector<32x32xf32> -> vector<32x32xf32>
    %58 = arith.addf %53, %57 : vector<32x32xf32>
    %59 = vector.broadcast %49 : vector<1x32xf32> to vector<32x32xf32>
    %60 = arith.addf %58, %59 : vector<32x32xf32>
    %cst_41 = arith.constant 0.000000e+00 : f32
    %61 = vector.broadcast %cst_41 : f32 to vector<32x32xf32>
    %62 = arith.maximumf %60, %61 : vector<32x32xf32>
    %63 = arith.truncf %62 : vector<32x32xf32> to vector<32x32xbf16>
    %c1_42 = arith.constant 1 : index
    %c0_43 = arith.constant 0 : index
    %c0_44 = arith.constant 0 : index
    %64 = vector.load %arg5[%c1_42, %c0_43, %c0_44] : memref<2x32x32xbf16, #tpu.memory_space<vmem>>, vector<1x32x32xbf16>
    %65 = vector.shape_cast %64 : vector<1x32x32xbf16> to vector<32x32xbf16>
    %cst_45 = arith.constant dense<0.000000e+00> : vector<32x32xf32>
    %66 = tpu.matmul %63, %65, %cst_45 {dimension_numbers = #tpu.dot_dimension_numbers<[1], [0], [0], [1], [0, 0, 1, 1], [], []>} : vector<32x32xbf16>, vector<32x32xbf16>, vector<32x32xf32> -> vector<32x32xf32>
    %67 = vector.broadcast %50 : vector<1x32xf32> to vector<32x32xf32>
    %68 = arith.addf %66, %67 : vector<32x32xf32>
    %cst_46 = arith.constant 0.000000e+00 : f32
    %69 = vector.broadcast %cst_46 : f32 to vector<32x32xf32>
    %70 = arith.maximumf %68, %69 : vector<32x32xf32>
    %c1_47 = arith.constant 1 : index
    %c0_48 = arith.constant 0 : index
    %c0_49 = arith.constant 0 : index
    %71 = vector.load %arg6[%c1_47, %c0_48, %c0_49] : memref<2x8x32xbf16, #tpu.memory_space<vmem>>, vector<1x8x32xbf16>
    %72 = vector.shape_cast %71 : vector<1x8x32xbf16> to vector<8x32xbf16>
    %73 = arith.truncf %70 : vector<32x32xf32> to vector<32x32xbf16>
    %cst_50 = arith.constant dense<0.000000e+00> : vector<32x8xf32>
    %74 = tpu.matmul %73, %72, %cst_50 {dimension_numbers = #tpu.dot_dimension_numbers<[1], [1], [0], [0], [0, 0, 1, 0], [], []>} : vector<32x32xbf16>, vector<8x32xbf16>, vector<32x8xf32> -> vector<32x8xf32>
    %cst_51 = arith.constant dense<0xFF800000> : vector<32xf32>
    %75 = vector.multi_reduction <maximumf>, %74, %cst_51 [1] : vector<32x8xf32> to vector<32xf32>
    %76 = vector.shape_cast %75 : vector<32xf32> to vector<32x1xf32>
    %77 = vector.broadcast %76 : vector<32x1xf32> to vector<32x8xf32>
    %78 = arith.subf %74, %77 : vector<32x8xf32>
    %79 = math.exp %78 : vector<32x8xf32>
    %cst_52 = arith.constant dense<0.000000e+00> : vector<32xf32>
    %80 = vector.multi_reduction <add>, %79, %cst_52 [1] : vector<32x8xf32> to vector<32xf32>
    %81 = vector.shape_cast %80 : vector<32xf32> to vector<32x1xf32>
    %82 = tpu.reciprocal %81 {approx = true} : vector<32x1xf32> -> vector<32x1xf32>
    %83 = vector.broadcast %82 : vector<32x1xf32> to vector<32x8xf32>
    %84 = arith.mulf %79, %83 : vector<32x8xf32>
    %85 = arith.truncf %84 : vector<32x8xf32> to vector<32x8xbf16>
    %cst_53 = arith.constant dense<0.000000e+00> : vector<32x32xf32>
    %86 = tpu.matmul %85, %72, %cst_53 {dimension_numbers = #tpu.dot_dimension_numbers<[1], [0], [0], [1], [0, 0, 1, 1], [], []>} : vector<32x8xbf16>, vector<8x32xbf16>, vector<32x32xf32> -> vector<32x32xf32>
    %c5 = arith.constant 5 : index
    %c0_54 = arith.constant 0 : index
    %87 = vector.load %arg3[%c5, %c0_54] : memref<8x128xf32, #tpu.memory_space<vmem>>, vector<1x128xf32>
    %88 = arith.truncf %46 : vector<32x32xf32> to vector<32x32xbf16>
    %c0_55 = arith.constant 0 : index
    %c0_56 = arith.constant 0 : index
    %89 = vector.load %arg7[%c0_55, %c0_56] : memref<64x128xbf16, #tpu.memory_space<vmem>>, vector<32x128xbf16>
    %cst_57 = arith.constant dense<0.000000e+00> : vector<32x128xf32>
    %90 = tpu.matmul %88, %89, %cst_57 {dimension_numbers = #tpu.dot_dimension_numbers<[1], [0], [0], [1], [0, 0, 1, 1], [], []>} : vector<32x32xbf16>, vector<32x128xbf16>, vector<32x128xf32> -> vector<32x128xf32>
    %91 = vector.broadcast %87 : vector<1x128xf32> to vector<32x128xf32>
    %92 = arith.addf %91, %90 : vector<32x128xf32>
    %93 = arith.truncf %86 : vector<32x32xf32> to vector<32x32xbf16>
    %c32_58 = arith.constant 32 : index
    %c0_59 = arith.constant 0 : index
    %94 = vector.load %arg7[%c32_58, %c0_59] : memref<64x128xbf16, #tpu.memory_space<vmem>>, vector<32x128xbf16>
    %cst_60 = arith.constant dense<0.000000e+00> : vector<32x128xf32>
    %95 = tpu.matmul %93, %94, %cst_60 {dimension_numbers = #tpu.dot_dimension_numbers<[1], [0], [0], [1], [0, 0, 1, 1], [], []>} : vector<32x32xbf16>, vector<32x128xbf16>, vector<32x128xf32> -> vector<32x128xf32>
    %96 = arith.addf %92, %95 : vector<32x128xf32>
    %cst_61 = arith.constant dense<0xFF800000> : vector<32xf32>
    %97 = vector.multi_reduction <maximumf>, %96, %cst_61 [1] : vector<32x128xf32> to vector<32xf32>
    %98 = vector.shape_cast %97 : vector<32xf32> to vector<32x1xf32>
    %99 = vector.broadcast %98 : vector<32x1xf32> to vector<32x128xf32>
    %100 = arith.subf %96, %99 : vector<32x128xf32>
    %101 = math.exp %100 : vector<32x128xf32>
    %cst_62 = arith.constant dense<0.000000e+00> : vector<32xf32>
    %102 = vector.multi_reduction <add>, %101, %cst_62 [1] : vector<32x128xf32> to vector<32xf32>
    %103 = vector.shape_cast %102 : vector<32xf32> to vector<32x1xf32>
    %104 = math.log %103 : vector<32x1xf32>
    %105 = vector.broadcast %104 : vector<32x1xf32> to vector<32x128xf32>
    %106 = arith.subf %100, %105 : vector<32x128xf32>
    %c0_63 = arith.constant 0 : index
    %c0_64 = arith.constant 0 : index
    %107 = vector.load %arg8[%c0_63, %c0_64] : memref<32x128xf32, #tpu.memory_space<vmem>>, vector<32x128xf32>
    tpu.vector_store %arg8[%c0_63, %c0_64], %106 {strides = array<i32>} : memref<32x128xf32, #tpu.memory_space<vmem>>, vector<32x128xf32>,
    return
  }
}

</mosaic_0001>

<bundles_post_ra>
// kernel: structgnn_forward.1
= control target key start
LH: loop header
LB: loop body
LE: loop exit
PB: predicated region body
PF: predicated region fallthrough
CT: control target
= control target key end

     0   :  { %vm61_vm0 = vcmask 130048   ;;  %vm129_vm1 = vcmask 261120   ;;  %vm485_vm2 = vcmask 64512   ;;  %vm538_vm3 = vcmask 1043456   ;;  %s1798_s2 = inlined_call_operand.vmem [shape: bf16[16,32], index: 2, kind: input, shape index: {}]   ;;  %s1799_s0 = inlined_call_operand.vmem [shape: bf16[32,16], index: 0, kind: input, shape index: {}]   ;;  %s1800_s1 = inlined_call_operand.vmem [shape: bf16[32,32], index: 1, kind: input, shape index: {}]   ;;  %s1801_s4 = inlined_call_operand.vmem [shape: bf16[2,64,32], index: 4, kind: input, shape index: {}]   ;;  %s1802_s3 = inlined_call_operand.vmem [shape: f32[8,128], index: 3, kind: input, shape index: {}]   ;;  %s1803_s5 = inlined_call_operand.vmem [shape: bf16[2,32,32], index: 5, kind: input, shape index: {}]   ;;  %s1804_s6 = inlined_call_operand.vmem [shape: bf16[2,8,32], index: 6, kind: input, shape index: {}]   ;;  %s1805_s7 = inlined_call_operand.vmem [shape: bf16[64,128], index: 7, kind: input, shape index: {}]   ;;  %s1806_s8 = inlined_call_operand.vmem [shape: f32[32,128], index: 8, kind: output, shape index: {}]  }
   0x1   :  { %v1501_v0 = vld [vmem:[%s1798_s2] sm:$0xff]   ;;  %v1503_v2 = vld [vmem:[%s1799_s0 + $0x8] sm:$0xff]   ;;  %v1506_v15 = vld [vmem:[%s1801_s4 + $0x10] sm:$0xff]  }
   0x2   :  { %v1502_v1 = vld [vmem:[%s1799_s0] sm:$0xff]   ;;  %1371 = vmatprep.subr.bf16.mxu0 %v1501_v0  ;;  %v1640_v16 = vld [vmem:[%s1800_s1 + $0x8] sm:$0xff]   ;;  %v1507_v17 = vld [vmem:[%s1801_s4 + $0x18] sm:$0xff]  }
   0x3   :  { %1372 = vmatpush3.bf16.msra.mxu0 %v1501_v0  ;;  %1373 = vmatprep.mubr.msk.bf16.mxu0 %vm61_vm0, %v1502_v1  ;;  %v1627_v3 = vld [vmem:[%s1800_s1] sm:$0xff]   ;;  %v1509_v25 = vld [vmem:[%s1801_s4 + $0x8] sm:$0xff]  }
   0x4   :  { %v1246_v5 = vld [vmem:[%s1802_s3] ss:$0 sm:$0xff]  ;;  %v1511_v27 = vld [vmem:[%s1803_s5 + $0x8] sm:$0xff]   ;;  %v1264_v28 = vld [vmem:[%s1802_s3 + $0x1] ss:$0 sm:$0xff] }
   0x5   :  { %v1508_v18 = vld [vmem:[%s1801_s4] sm:$0xff]  }
   0x6   :  { %1374 = vmatmul.mubr.msk.bf16.vlgmr.msra.gmra.mrb[0].mxu0 %vm61_vm0, %v1503_v2  ;;  %v1510_v26 = vld [vmem:[%s1803_s5] sm:$0xff]  }
   0x7   :  { %1381 = vmatprep.mubr.msk.bf16.mxu0 %vm129_vm1, %v1627_v3  ;;  %1401 = vmatprep.subr.bf16.mxu1 %v1510_v26  ;;  %v1671_v43 = vld [vmem:[%s1804_s6] sm:$0xf] }
   0x8   :  { %1402 = vmatpush3.bf16.msra.mxu1 %v1510_v26  ;;  %v434_v44 = vsel %vm129_vm1, %v1671_v43, 0  ;;  %v1265_v45 = vld [vmem:[%s1802_s3 + $0x2] ss:$0 sm:$0xff] }
   0x9   :  { %1403 = vmatprep.subr.bf16.mxu1 %v1511_v27 }
   0xc   :  { %1404 = vmatpush3.bf16.msra.mxu1 %v1511_v27 }
   0xd   :  { %1497 = vmatprep.subr.msk.bf16.mxu1 %vm129_vm1, %v1671_v43 }
  0xd9   :  { %v1375_v4 = vpop.f32.mrb[0].mxu0 }
  0xda   :  { %v102_v6 = vpop.f32.mrb[1].mxu0  ;;  %v111_v8 = vadd.f32 %v1375_v4, %v1246_v5 }
  0xdb   :  { %v1376_v7 = vpop.f32.mrb[2].mxu0  ;;  %v103_v11 = vadd.f32 %v1246_v5, %v102_v6 }
  0xdc   :  { %v114_v9 = vadd.f32 %v1376_v7, %v1246_v5  ;;  %v105_v10 = vpop.f32.mrb[3].mxu0 }
  0xdd   :  { %v106_v12 = vadd.f32 %v1246_v5, %v105_v10 }
  0xde   :  { %v118_v13 = vpack.c.bf16 %v114_v9, %v111_v8 }
  0xdf   :  { %v117_v14 = vpack.c.bf16 %v106_v12, %v103_v11 }
  0xe1   :  { %1377 = vmatprep.subr.bf16.mxu0 %v117_v14 }
  0xe2   :  { %1378 = vmatpush3.bf16.msra.mxu0 %v117_v14 }
  0xe3   :  { %1379 = vmatprep.subr.bf16.mxu0 %v118_v13 }
  0xe6   :  { %1380 = vmatpush3.bf16.msra.mxu0 %v118_v13 }
  0xe7   :  { %1385 = vmatprep.subr.bf16.mxu0 %v1506_v15 }
  0xe9   :  { %1382 = vmatmul.mubr.msk.bf16.vlgmr.msra.gmra.mrb[4].mxu0 %vm129_vm1, %v1640_v16 }
  0xea   :  { %1386 = vmatpush3.bf16.msra.mxu0 %v1506_v15 }
  0xeb   :  { %1387 = vmatprep.subr.bf16.mxu0 %v1507_v17 }
  0xee   :  { %1388 = vmatpush3.bf16.msra.mxu0 %v1507_v17 }
  0xef   :  { %1393 = vmatprep.subr.bf16.mxu0 %v1508_v18 }
 0x1bc   :  { %v1383_v19 = vpop.f32.mrb[4].mxu0 }
 0x1bd   :  { %v170_v20 = vpop.f32.mrb[5].mxu0 }
 0x1be   :  { %v1384_v21 = vpop.f32.mrb[6].mxu0 }
 0x1bf   :  { %v192_v22 = vpack.c.bf16 %v1384_v21, %v1383_v19  ;;  %v173_v23 = vpop.f32.mrb[7].mxu0 }
 0x1c0   :  { %v191_v24 = vpack.c.bf16 %v173_v23, %v170_v20 }
 0x1c2   :  { %1389 = vmatprep.mubr.msk.bf16.mxu0 %vm129_vm1, %v191_v24 }
 0x1c3   :  { %1390 = vmatmul.mubr.msk.bf16.vlgmr.msra.gmra.mrb[8].mxu0 %vm129_vm1, %v192_v22 }
 0x1c4   :  { %1394 = vmatpush3.bf16.msra.mxu0 %v1508_v18  ;;  %1397 = vmatprep.mubr.msk.bf16.mxu0 %vm129_vm1, %v117_v14 }
 0x1c5   :  { %1395 = vmatprep.subr.bf16.mxu0 %v1509_v25 }
 0x1c8   :  { %1396 = vmatpush3.bf16.msra.mxu0 %v1509_v25  ;;  %v539_v25 = vsel %vm538_vm3, %v1671_v43, 0 }
 0x1c9   :  { %1498 = vmatprep.subr.msk.bf16.mxu0 %vm538_vm3, %v1671_v43 }
 0x1cf   :  { %1398 = vmatmul.mubr.msk.bf16.vlgmr.msra.gmra.mrb[8].mxu0 %vm129_vm1, %v118_v13 }
 0x1d0   :  { %1416 = vmatpush3.bf16.msra.mxu0 %v539_v25 }
 0x2a2   :  { %v1399_v29 = vpop.f32.mrb[8].mxu0 }
 0x2a3   :  { %v337_v30 = vadd.f32 %v1399_v29, %v1264_v28  ;;  %v316_v31 = vpop.f32.mrb[9].mxu0 }
 0x2a4   :  { %v335_v32 = vadd.f32 %v1264_v28, %v316_v31  ;;  %v1400_v33 = vpop.f32.mrb[10].mxu0 }
 0x2a5   :  { %v338_v34 = vadd.f32 %v1400_v33, %v1264_v28  ;;  %v319_v35 = vpop.f32.mrb[11].mxu0  ;;  %v341_v37 = vmax.f32 %v337_v30, 0.0 }
 0x2a6   :  { %v336_v36 = vadd.f32 %v1264_v28, %v319_v35  ;;  %v339_v39 = vmax.f32 %v335_v32, 0.0 }
 0x2a7   :  { %v342_v38 = vmax.f32 %v338_v34, 0.0 }
 0x2a8   :  { %v340_v40 = vmax.f32 %v336_v36, 0.0 }
 0x2a9   :  { %v344_v41 = vpack.c.bf16 %v342_v38, %v341_v37 }
 0x2aa   :  { %v343_v42 = vpack.c.bf16 %v340_v40, %v339_v39  ;;  %v1512_v40 = vld [vmem:[%s1801_s4 + $0x30] sm:$0xff]  }
 0x2ab   :  { %1429 = vmatprep.subr.bf16.mxu0 %v1512_v40 }
 0x2ac   :  { %1405 = vmatprep.mubr.msk.bf16.mxu1 %vm129_vm1, %v343_v42 }
 0x2ad   :  { %1406 = vmatmul.mubr.msk.bf16.vlgmr.msra.gmra.mrb[0].mxu1 %vm129_vm1, %v344_v41 }
 0x2ae   :  { %1410 = vmatpush3.bf16.xpose.msra.mxu1 %v434_v44 }
 0x380   :  { %v1407_v46 = vpop.f32.mrb[0].mxu1 }
 0x381   :  { %v414_v47 = vadd.f32 %v1407_v46, %v1265_v45  ;;  %v405_v48 = vpop.f32.mrb[1].mxu1 }
 0x382   :  { %v406_v49 = vadd.f32 %v1265_v45, %v405_v48  ;;  %v1408_v50 = vpop.f32.mrb[2].mxu1  ;;  %v1514_v48 = vld [vmem:[%s1801_s4 + $0x20] sm:$0xff]  }
 0x383   :  { %v417_v51 = vadd.f32 %v1408_v50, %v1265_v45  ;;  %v408_v52 = vpop.f32.mrb[3].mxu1  ;;  %v422_v54 = vmax.f32 %v414_v47, 0.0  ;;  %v1513_v47 = vld [vmem:[%s1801_s4 + $0x38] sm:$0xff]  }
 0x384   :  { %v409_v53 = vadd.f32 %v1265_v45, %v408_v52  ;;  %v420_v56 = vmax.f32 %v406_v49, 0.0 }
 0x385   :  { %v423_v55 = vmax.f32 %v417_v51, 0.0 }
 0x386   :  { %v421_v57 = vmax.f32 %v409_v53, 0.0 }
 0x387   :  { %v426_v58 = vpack.c.bf16 %v423_v55, %v422_v54  ;;  %v1516_v55 = vld [vmem:[%s1803_s5 + $0x10] sm:$0xff]  }
 0x388   :  { %v425_v59 = vpack.c.bf16 %v421_v57, %v420_v56  ;;  %v1517_v56 = vld [vmem:[%s1803_s5 + $0x18] sm:$0xff]   ;;  %v1292_v57 = vld [vmem:[%s1802_s3 + $0x3] ss:$0 sm:$0xff] }
 0x38a   :  { %1411 = vmatprep.mubr.msk.bf16.mxu1 %vm129_vm1, %v425_v59 }
 0x38b   :  { %1412 = vmatmul.mubr.msk.bf16.vlgmr.msra.gmra.mrb[4].mxu1 %vm129_vm1, %v426_v58 }
 0x38c   :  { %1425 = vmatprep.mubr.msk.bf16.mxu1 %vm129_vm1, %v1627_v3 }
 0x45e   :  { %v1413_v60 = vpop.f32.mrb[4].mxu1 }
 0x45f   :  { %v470_v61 = vpop.f32.mrb[5].mxu1  ;;  %v492_v62 = vsel %vm485_vm2, %v1413_v60, -inf }
 0x460   :  { %493 = vmax.xlane.f32.xlu1 %v492_v62  ;;  %v1414_v63 = vpop.f32.mrb[6].mxu1  ;;  %v486_v0 = vsel %vm485_vm2, %v470_v61, -inf }
 0x461   :  { %487 = vmax.xlane.f32.xlu0 %v486_v0  ;;  %v473_v1 = vpop.f32.mrb[7].mxu1  ;;  %v495_v2 = vsel %vm485_vm2, %v1414_v63, -inf }
 0x462   :  { %v489_v4 = vsel %vm485_vm2, %v473_v1, -inf }
 0x464   :  { %496 = vmax.xlane.f32.xlu1 %v495_v2 }
 0x465   :  { %490 = vmax.xlane.f32.xlu0 %v489_v4 }
 0x4ed   :  { %v494_v5 = vpop.xlane.xlu1 %493 }
 0x4ee   :  { %v500_v6 = vsub.f32 %v1413_v60, %v494_v5  ;;  %v488_v3 = vpop.xlane.xlu0 %487 }
 0x4ef   :  { %v498_v7 = vsub.f32 %v470_v61, %v488_v3 }
 0x4f0   :  { %v506_v8 = vmul.f32 1.442695, %v500_v6 }
 0x4f1   :  { %v502_v9 = vmul.f32 1.442695, %v498_v7  ;;  %v497_v10 = vpop.xlane.xlu1 %496 }
 0x4f2   :  { %v501_v11 = vsub.f32 %v1414_v63, %v497_v10  ;;  %v491_v12 = vpop.xlane.xlu0 %490  ;;  %v1518_v10 = vld [vmem:[%s1805_s7] sm:$0xff]  }
 0x4f3   :  { %1522 = vpow2.f32 %v502_v9  ;;  %v499_v13 = vsub.f32 %v473_v1, %v491_v12 }
 0x4f4   :  { %1524 = vpow2.f32 %v506_v8  ;;  %v508_v14 = vmul.f32 1.442695, %v501_v11  ;;  %v1740_v8 = vld [vmem:[%s1804_s6 + $0x4] sm:$0xf] }
 0x4f5   :  { %v504_v15 = vmul.f32 1.442695, %v499_v13  ;;  %v893_v9 = vsel %vm129_vm1, %v1740_v8, 0  ;;  %v1297_v11 = vld [vmem:[%s1802_s3 + $0x4] ss:$0 sm:$0xff] }
 0x4f7   :  { %1526 = vpow2.f32 %v504_v15 }
 0x4f8   :  { %1528 = vpow2.f32 %v508_v14 }
 0x4fd   :  { %v1523_v17 = vpop.eup %1522 }
 0x4fe   :  { %v510_v18 = vsel %vm485_vm2, %v1523_v17, 0.0  ;;  %v1525_v19 = vpop.eup %1524 }
 0x4ff   :  { %511 = vadd.xlane.f32.xlu0 %v510_v18  ;;  %v516_v21 = vsel %vm485_vm2, %v1525_v19, 0.0 }
 0x501   :  { %v1527_v20 = vpop.eup %1526 }
 0x502   :  { %v513_v22 = vsel %vm485_vm2, %v1527_v20, 0.0  ;;  %v1529_v23 = vpop.eup %1528 }
 0x503   :  { %517 = vadd.xlane.f32.xlu0 %v516_v21  ;;  %514 = vadd.xlane.f32.xlu1 %v513_v22  ;;  %v519_v24 = vsel %vm485_vm2, %v1529_v23, 0.0 }
 0x507   :  { %520 = vadd.xlane.f32.xlu1 %v519_v24 }
 0x58c   :  { %v512_v26 = vpop.xlane.xlu0 %511 }
 0x58d   :  { %1530 = vrcp.f32 %v512_v26 }
 0x590   :  { %v515_v27 = vpop.xlane.xlu1 %514  ;;  %v518_v28 = vpop.xlane.xlu0 %517 }
 0x591   :  { %1532 = vrcp.f32 %v515_v27  ;;  %v1519_v27 = vld [vmem:[%s1805_s7 + $0x8] sm:$0xff]  }
 0x592   :  { %1534 = vrcp.f32 %v518_v28 }
 0x594   :  { %v521_v29 = vpop.xlane.xlu1 %520 }
 0x595   :  { %1536 = vrcp.f32 %v521_v29 }
 0x597   :  { %v1531_v30 = vpop.eup %1530 }
 0x598   :  { %v526_v32 = vmul.f32 %v1531_v30, %v1523_v17 }
 0x59b   :  { %v1533_v31 = vpop.eup %1532 }
 0x59c   :  { %v527_v33 = vmul.f32 %v1533_v31, %v1527_v20  ;;  %v1535_v34 = vpop.eup %1534 }
 0x59d   :  { %v528_v37 = vmul.f32 %v1535_v34, %v1525_v19 }
 0x59e   :  { %v530_v35 = vpack.c.bf16 %v527_v33, %v526_v32 }
 0x59f   :  { %v1537_v36 = vpop.eup %1536 }
 0x5a0   :  { %v529_v38 = vmul.f32 %v1537_v36, %v1529_v23  ;;  %1417 = vmatprep.mubr.msk.bf16.mxu0 %vm485_vm2, %v530_v35 }
 0x5a2   :  { %v531_v39 = vpack.c.bf16 %v529_v38, %v528_v37 }
 0x5a4   :  { %1418 = vmatmul.mubr.msk.bf16.vlgmr.msra.gmra.mrb[12].mxu0 %vm485_vm2, %v531_v39 }
 0x5a5   :  { %1430 = vmatpush3.bf16.msra.mxu0 %v1512_v40 }
 0x5a6   :  { %1431 = vmatprep.subr.bf16.mxu0 %v1513_v47 }
 0x5a9   :  { %1432 = vmatpush3.bf16.msra.mxu0 %v1513_v47 }
 0x5aa   :  { %1437 = vmatprep.subr.bf16.mxu0 %v1514_v48 }
 0x677   :  { %v1419_v41 = vpop.f32.mrb[12].mxu0 }
 0x678   :  { %v575_v42 = vpop.f32.mrb[13].mxu0 }
 0x679   :  { %v1420_v43 = vpop.f32.mrb[14].mxu0 }
 0x67a   :  { %v1701_v44 = vpack.c.bf16 %v1420_v43, %v1419_v41  ;;  %v578_v45 = vpop.f32.mrb[15].mxu0 }
 0x67b   :  { %v1703_v46 = vpack.c.bf16 %v578_v45, %v575_v42 }
 0x67d   :  { %1421 = vmatprep.subr.bf16.mxu1 %v1703_v46 }
 0x67e   :  { %1422 = vmatpush3.bf16.msra.mxu1 %v1703_v46 }
 0x67f   :  { %1423 = vmatprep.subr.bf16.mxu1 %v1701_v44 }
 0x682   :  { %1424 = vmatpush3.bf16.msra.mxu1 %v1701_v44 }
 0x683   :  { %1445 = vmatprep.subr.bf16.mxu1 %v1516_v55 }
 0x685   :  { %1426 = vmatmul.mubr.msk.bf16.vlgmr.msra.gmra.mrb[8].mxu1 %vm129_vm1, %v1640_v16  ;;  %v1515_v16 = vld [vmem:[%s1801_s4 + $0x28] sm:$0xff]  }
 0x686   :  { %1446 = vmatpush3.bf16.msra.mxu1 %v1516_v55  ;;  %v996_v55 = vsel %vm538_vm3, %v1740_v8, 0 }
 0x687   :  { %1447 = vmatprep.subr.bf16.mxu1 %v1517_v56 }
 0x68a   :  { %1448 = vmatpush3.bf16.msra.mxu1 %v1517_v56  ;;  %v1520_v56 = vld [vmem:[%s1805_s7 + $0x10] sm:$0xff]  }
 0x68b   :  { %1499 = vmatprep.subr.msk.bf16.mxu1 %vm129_vm1, %v1740_v8 }
 0x758   :  { %v1427_v49 = vpop.f32.mrb[8].mxu1 }
 0x759   :  { %v626_v50 = vpop.f32.mrb[9].mxu1 }
 0x75a   :  { %v1428_v51 = vpop.f32.mrb[10].mxu1 }
 0x75b   :  { %v649_v52 = vpack.c.bf16 %v1428_v51, %v1427_v49  ;;  %v629_v53 = vpop.f32.mrb[11].mxu1 }
 0x75c   :  { %v648_v54 = vpack.c.bf16 %v629_v53, %v626_v50 }
 0x75e   :  { %1433 = vmatprep.mubr.msk.bf16.mxu0 %vm129_vm1, %v648_v54 }
 0x75f   :  { %1434 = vmatmul.mubr.msk.bf16.vlgmr.msra.gmra.mrb[16].mxu0 %vm129_vm1, %v649_v52 }
 0x760   :  { %1438 = vmatpush3.bf16.msra.mxu0 %v1514_v48  ;;  %1441 = vmatprep.mubr.msk.bf16.mxu0 %vm129_vm1, %v1703_v46 }
 0x761   :  { %1439 = vmatprep.subr.bf16.mxu0 %v1515_v16 }
 0x764   :  { %1440 = vmatpush3.bf16.msra.mxu0 %v1515_v16 }
 0x765   :  { %1500 = vmatprep.subr.msk.bf16.mxu0 %vm538_vm3, %v1740_v8 }
 0x76b   :  { %1442 = vmatmul.mubr.msk.bf16.vlgmr.msra.gmra.mrb[16].mxu0 %vm129_vm1, %v1701_v44 }
 0x76c   :  { %1460 = vmatpush3.bf16.msra.mxu0 %v996_v55 }
 0x83e   :  { %v1443_v58 = vpop.f32.mrb[16].mxu0 }
 0x83f   :  { %v794_v59 = vadd.f32 %v1443_v58, %v1292_v57  ;;  %v773_v60 = vpop.f32.mrb[17].mxu0 }
 0x840   :  { %v792_v61 = vadd.f32 %v1292_v57, %v773_v60  ;;  %v1444_v62 = vpop.f32.mrb[18].mxu0 }
 0x841   :  { %v795_v63 = vadd.f32 %v1444_v62, %v1292_v57  ;;  %v776_v0 = vpop.f32.mrb[19].mxu0  ;;  %v798_v2 = vmax.f32 %v794_v59, 0.0 }
 0x842   :  { %v793_v1 = vadd.f32 %v1292_v57, %v776_v0  ;;  %v796_v5 = vmax.f32 %v792_v61, 0.0 }
 0x843   :  { %v799_v4 = vmax.f32 %v795_v63, 0.0 }
 0x844   :  { %v797_v6 = vmax.f32 %v793_v1, 0.0 }
 0x845   :  { %v801_v3 = vpack.c.bf16 %v799_v4, %v798_v2 }
 0x846   :  { %v800_v7 = vpack.c.bf16 %v797_v6, %v796_v5 }
 0x848   :  { %1449 = vmatprep.mubr.msk.bf16.mxu1 %vm129_vm1, %v800_v7  ;;  %v1521_v7 = vld [vmem:[%s1805_s7 + $0x18] sm:$0xff]  }
 0x849   :  { %1450 = vmatmul.mubr.msk.bf16.vlgmr.msra.gmra.mrb[12].mxu1 %vm129_vm1, %v801_v3 }
 0x84a   :  { %1454 = vmatpush3.bf16.xpose.msra.mxu1 %v893_v9 }
 0x84b   :  { %1465 = vmatprep.subr.bf16.mxu1 %v1518_v10 }
 0x91c   :  { %v1451_v12 = vpop.f32.mrb[12].mxu1 }
 0x91d   :  { %v872_v13 = vadd.f32 %v1451_v12, %v1297_v11  ;;  %v863_v14 = vpop.f32.mrb[13].mxu1 }
 0x91e   :  { %v864_v15 = vadd.f32 %v1297_v11, %v863_v14  ;;  %v1452_v17 = vpop.f32.mrb[14].mxu1  ;;  %v1311_v14 = vld [vmem:[%s1802_s3 + $0x5] ss:$0 sm:$0xff] }
 0x91f   :  { %v875_v18 = vadd.f32 %v1452_v17, %v1297_v11  ;;  %v866_v19 = vpop.f32.mrb[15].mxu1  ;;  %v880_v21 = vmax.f32 %v872_v13, 0.0 }
 0x920   :  { %v867_v20 = vadd.f32 %v1297_v11, %v866_v19  ;;  %v878_v23 = vmax.f32 %v864_v15, 0.0 }
 0x921   :  { %v881_v22 = vmax.f32 %v875_v18, 0.0 }
 0x922   :  { %v879_v24 = vmax.f32 %v867_v20, 0.0 }
 0x923   :  { %v885_v25 = vpack.c.bf16 %v881_v22, %v880_v21 }
 0x924   :  { %v884_v26 = vpack.c.bf16 %v879_v24, %v878_v23 }
 0x926   :  { %1455 = vmatprep.mubr.msk.bf16.mxu1 %vm129_vm1, %v884_v26 }
 0x927   :  { %1456 = vmatmul.mubr.msk.bf16.vlgmr.msra.gmra.mrb[16].mxu1 %vm129_vm1, %v885_v25 }
 0x928   :  { %1466 = vmatpush3.bf16.msra.mxu1 %v1518_v10  ;;  %1469 = vmatprep.mubr.msk.bf16.mxu1 %vm129_vm1, %v1703_v46 }
 0x929   :  { %1467 = vmatprep.subr.bf16.mxu1 %v1519_v27 }
 0x92c   :  { %1468 = vmatpush3.bf16.msra.mxu1 %v1519_v27 }
 0x92d   :  { %1473 = vmatprep.subr.bf16.mxu1 %v1520_v56 }
 0x92f   :  { %1470 = vmatmul.mubr.msk.bf16.vlgmr.msra.gmra.mrb[20].mxu1 %vm129_vm1, %v1701_v44 }
 0x930   :  { %1474 = vmatpush3.bf16.msra.mxu1 %v1520_v56 }
 0x931   :  { %1475 = vmatprep.subr.bf16.mxu1 %v1521_v7 }
 0x934   :  { %1476 = vmatpush3.bf16.msra.mxu1 %v1521_v7 }
 0x9fa   :  { %v1457_v28 = vpop.f32.mrb[16].mxu1 }
 0x9fb   :  { %v929_v29 = vpop.f32.mrb[17].mxu1  ;;  %v950_v34 = vsel %vm485_vm2, %v1457_v28, -inf }
 0x9fc   :  { %v1458_v30 = vpop.f32.mrb[18].mxu1  ;;  %v944_v31 = vsel %vm485_vm2, %v929_v29, -inf }
 0x9fd   :  { %945 = vmax.xlane.f32.xlu0 %v944_v31  ;;  %v932_v32 = vpop.f32.mrb[19].mxu1  ;;  %v953_v35 = vsel %vm485_vm2, %v1458_v30, -inf }
 0x9fe   :  { %v947_v33 = vsel %vm485_vm2, %v932_v32, -inf }
 0x9ff   :  { %948 = vmax.xlane.f32.xlu1 %v947_v33 }
 0xa01   :  { %951 = vmax.xlane.f32.xlu0 %v950_v34 }
 0xa03   :  { %954 = vmax.xlane.f32.xlu1 %v953_v35 }
 0xa8a   :  { %v946_v36 = vpop.xlane.xlu0 %945 }
 0xa8b   :  { %v956_v37 = vsub.f32 %v929_v29, %v946_v36 }
 0xa8c   :  { %v949_v38 = vpop.xlane.xlu1 %948 }
 0xa8d   :  { %v960_v39 = vmul.f32 1.442695, %v956_v37  ;;  %v957_v40 = vsub.f32 %v932_v32, %v949_v38 }
 0xa8e   :  { %v952_v41 = vpop.xlane.xlu0 %951 }
 0xa8f   :  { %1538 = vpow2.f32 %v960_v39  ;;  %v962_v42 = vmul.f32 1.442695, %v957_v40  ;;  %v958_v43 = vsub.f32 %v1457_v28, %v952_v41 }
 0xa90   :  { %v955_v44 = vpop.xlane.xlu1 %954 }
 0xa91   :  { %1540 = vpow2.f32 %v962_v42  ;;  %v964_v45 = vmul.f32 1.442695, %v958_v43  ;;  %v959_v46 = vsub.f32 %v1458_v30, %v955_v44 }
 0xa93   :  { %1542 = vpow2.f32 %v964_v45  ;;  %v966_v47 = vmul.f32 1.442695, %v959_v46 }
 0xa95   :  { %1544 = vpow2.f32 %v966_v47 }
 0xa99   :  { %v1539_v48 = vpop.eup %1538 }
 0xa9a   :  { %v968_v49 = vsel %vm485_vm2, %v1539_v48, 0.0 }
 0xa9b   :  { %v1541_v50 = vpop.eup %1540  ;;  %969 = vadd.xlane.f32.xlu0 %v968_v49 }
 0xa9c   :  { %v971_v51 = vsel %vm485_vm2, %v1541_v50, 0.0 }
 0xa9d   :  { %v1543_v52 = vpop.eup %1542  ;;  %972 = vadd.xlane.f32.xlu1 %v971_v51 }
 0xa9e   :  { %v974_v53 = vsel %vm485_vm2, %v1543_v52, 0.0 }
 0xa9f   :  { %v1545_v54 = vpop.eup %1544  ;;  %975 = vadd.xlane.f32.xlu0 %v974_v53 }
 0xaa0   :  { %v977_v16 = vsel %vm485_vm2, %v1545_v54, 0.0 }
 0xaa1   :  { %978 = vadd.xlane.f32.xlu1 %v977_v16 }
 0xb28   :  { %v970_v57 = vpop.xlane.xlu0 %969 }
 0xb29   :  { %1546 = vrcp.f32 %v970_v57 }
 0xb2a   :  { %v973_v58 = vpop.xlane.xlu1 %972 }
 0xb2b   :  { %1548 = vrcp.f32 %v973_v58 }
 0xb2c   :  { %v976_v59 = vpop.xlane.xlu0 %975 }
 0xb2d   :  { %1550 = vrcp.f32 %v976_v59 }
 0xb2e   :  { %v979_v60 = vpop.xlane.xlu1 %978 }
 0xb2f   :  { %1552 = vrcp.f32 %v979_v60 }
 0xb33   :  { %v1547_v61 = vpop.eup %1546 }
 0xb34   :  { %v984_v63 = vmul.f32 %v1547_v61, %v1539_v48 }
 0xb35   :  { %v1549_v62 = vpop.eup %1548 }
 0xb36   :  { %v985_v0 = vmul.f32 %v1549_v62, %v1541_v50 }
 0xb37   :  { %v1551_v1 = vpop.eup %1550 }
 0xb38   :  { %v988_v2 = vpack.c.bf16 %v985_v0, %v984_v63  ;;  %v986_v5 = vmul.f32 %v1551_v1, %v1543_v52 }
 0xb39   :  { %v1553_v4 = vpop.eup %1552 }
 0xb3a   :  { %v987_v6 = vmul.f32 %v1553_v4, %v1545_v54  ;;  %1461 = vmatprep.mubr.msk.bf16.mxu0 %vm485_vm2, %v988_v2 }
 0xb3c   :  { %v989_v3 = vpack.c.bf16 %v987_v6, %v986_v5 }
 0xb3e   :  { %1462 = vmatmul.mubr.msk.bf16.vlgmr.msra.gmra.mrb[20].mxu0 %vm485_vm2, %v989_v3 }
 0xc11   :  { %v1463_v8 = vpop.f32.mrb[20].mxu0 }
 0xc12   :  { %v1032_v9 = vpop.f32.mrb[21].mxu0 }
 0xc13   :  { %v1464_v10 = vpop.f32.mrb[22].mxu0 }
 0xc14   :  { %v1122_v11 = vpack.c.bf16 %v1464_v10, %v1463_v8  ;;  %v1035_v12 = vpop.f32.mrb[23].mxu0 }
 0xc15   :  { %v1121_v13 = vpack.c.bf16 %v1035_v12, %v1032_v9 }
 0xc17   :  { %1477 = vmatprep.mubr.msk.bf16.mxu1 %vm129_vm1, %v1121_v13 }
 0xc18   :  { %1478 = vmatmul.mubr.msk.bf16.vlgmr.msra.gmra.mrb[20].mxu1 %vm129_vm1, %v1122_v11 }
 0xceb   :  { %v1479_v15 = vpop.f32.mrb[20].mxu1 }
 0xcec   :  { %v1179_v17 = vpop.f32.mrb[21].mxu1  ;;  %v1481_v22 = vadd.f32 %v1479_v15, %v1311_v14 }
 0xced   :  { %v1482_v18 = vadd.f32 %v1311_v14, %v1179_v17  ;;  %v1480_v19 = vpop.f32.mrb[22].mxu1 }
 0xcee   :  { %v1182_v20 = vpop.f32.mrb[23].mxu1  ;;  %v1483_v23 = vadd.f32 %v1480_v19, %v1311_v14 }
 0xcef   :  { %v1484_v21 = vadd.f32 %v1311_v14, %v1182_v20  ;;  %1198 = vmax.xlane.f32.xlu0 %v1482_v18 }
 0xcf1   :  { %1200 = vmax.xlane.f32.xlu1 %v1484_v21 }
 0xcf3   :  { %1202 = vmax.xlane.f32.xlu0 %v1481_v22 }
 0xcf5   :  { %1204 = vmax.xlane.f32.xlu1 %v1483_v23 }
 0xd7c   :  { %v1199_v24 = vpop.xlane.xlu0 %1198 }
 0xd7d   :  { %v1206_v25 = vsub.f32 %v1482_v18, %v1199_v24 }
 0xd7e   :  { %v1201_v26 = vpop.xlane.xlu1 %1200 }
 0xd7f   :  { %v1210_v27 = vmul.f32 1.442695, %v1206_v25  ;;  %v1207_v28 = vsub.f32 %v1484_v21, %v1201_v26 }
 0xd80   :  { %v1203_v29 = vpop.xlane.xlu0 %1202 }
 0xd81   :  { %1554 = vpow2.f32 %v1210_v27  ;;  %v1212_v30 = vmul.f32 1.442695, %v1207_v28  ;;  %v1208_v31 = vsub.f32 %v1481_v22, %v1203_v29 }
 0xd82   :  { %v1205_v32 = vpop.xlane.xlu1 %1204 }
 0xd83   :  { %1556 = vpow2.f32 %v1212_v30  ;;  %v1214_v33 = vmul.f32 1.442695, %v1208_v31  ;;  %v1209_v34 = vsub.f32 %v1483_v23, %v1205_v32 }
 0xd85   :  { %1558 = vpow2.f32 %v1214_v33  ;;  %v1216_v35 = vmul.f32 1.442695, %v1209_v34 }
 0xd87   :  { %1560 = vpow2.f32 %v1216_v35 }
 0xd8b   :  { %v1555_v36 = vpop.eup %1554 }
 0xd8c   :  { %1218 = vadd.xlane.f32.xlu0 %v1555_v36 }
 0xd8d   :  { %v1557_v37 = vpop.eup %1556 }
 0xd8e   :  { %1220 = vadd.xlane.f32.xlu1 %v1557_v37 }
 0xd8f   :  { %v1559_v38 = vpop.eup %1558 }
 0xd90   :  { %1222 = vadd.xlane.f32.xlu0 %v1559_v38 }
 0xd91   :  { %v1561_v39 = vpop.eup %1560 }
 0xd92   :  { %1224 = vadd.xlane.f32.xlu1 %v1561_v39 }
 0xe19   :  { %v1219_v40 = vpop.xlane.xlu0 %1218 }
 0xe1a   :  { %1562 = vlog2.f32 %v1219_v40 }
 0xe1b   :  { %v1221_v41 = vpop.xlane.xlu1 %1220 }
 0xe1c   :  { %1564 = vlog2.f32 %v1221_v41 }
 0xe1d   :  { %v1223_v42 = vpop.xlane.xlu0 %1222 }
 0xe1e   :  { %1566 = vlog2.f32 %v1223_v42 }
 0xe1f   :  { %v1225_v43 = vpop.xlane.xlu1 %1224 }
 0xe20   :  { %1568 = vlog2.f32 %v1225_v43 }
 0xe24   :  { %v1563_v44 = vpop.eup %1562 }
 0xe25   :  { %v1227_v45 = vmul.f32 0.6931472, %v1563_v44 }
 0xe26   :  { %v1565_v46 = vpop.eup %1564 }
 0xe27   :  { %v1234_v47 = vsub.f32 %v1206_v25, %v1227_v45  ;;  %v1229_v48 = vmul.f32 0.6931472, %v1565_v46 }
 0xe28   :  { %v1567_v49 = vpop.eup %1566 }
 0xe29   :  { %1238 = vst [vmem:[%s1806_s8] sm:$0xff] %v1234_v47  ;;  %v1235_v50 = vsub.f32 %v1207_v28, %v1229_v48  ;;  %v1231_v51 = vmul.f32 0.6931472, %v1567_v49 }
 0xe2a   :  { %v1569_v52 = vpop.eup %1568 }
 0xe2b   :  { %1239 = vst [vmem:[%s1806_s8 + $0x8] sm:$0xff] %v1235_v50  ;;  %v1236_v53 = vsub.f32 %v1208_v31, %v1231_v51  ;;  %v1233_v54 = vmul.f32 0.6931472, %v1569_v52 }
 0xe2d   :  { %1240 = vst [vmem:[%s1806_s8 + $0x10] sm:$0xff] %v1236_v53  ;;  %v1237_v16 = vsub.f32 %v1209_v34, %v1233_v54 }
 0xe2f   :  { %1241 = vst [vmem:[%s1806_s8 + $0x18] sm:$0xff] %v1237_v16 }

</bundles_post_ra>
